<compile_context>
chip_gen: v6e
topology: v6e:2x2x1
jax: 0.10.0
libtpu: 0.0.40
codegen_flags: <defaults>
</compile_context>

<pallas_src>
import jax
import jax.numpy as jnp
from jax.experimental import pallas as pl
from jax.experimental.pallas import tpu as pltpu


# ----------------------------------------------------------------------------
# Kernel
# ----------------------------------------------------------------------------
def _qnet_kernel(
    sa_ref,                 # (TM, state_dim + action_dim)  f32  (batch tile)
    w1_ref, b1_ref,         # fused head layer 1: (in, 256)  bf16 / (1, 256) f32
    w2_ref, b2_ref,         # fused head layer 2: (256, 256) bf16 / (1, 256) f32
    w3_ref, b3_ref,         # latent mlp layer 1: (256, 64)  bf16 / (1, 64)  f32
    w4_ref, b4_ref,         # latent mlp layer 2: (64, 32)   bf16 / (1, 32)  f32
    w5_ref, b5_ref,         # final layer as row vector: (1, 32) f32 / (1, 1) f32
    q_ref,                  # (TM, 1) f32
):
    x = sa_ref[...]
    cdt = w1_ref.dtype  # MXU compute dtype (bf16); accumulate in f32; VPU math in f32

    # Fused state+action heads: [s|a] @ blockdiag(sw1, aw1), then blockdiag(sw2, aw2).
    h = jnp.dot(x.astype(cdt), w1_ref[...], preferred_element_type=jnp.float32)
    h = jnp.maximum(h + b1_ref[...], 0.0)
    latent = jnp.dot(h.astype(cdt), w2_ref[...], preferred_element_type=jnp.float32)
    latent = jnp.maximum(latent + b2_ref[...], 0.0)   # == [h_state | h_action], no concat

    # Latent MLP: 256 -> 64 -> 32 (ReLU), then 32 -> 1 without the MXU.
    z = jnp.dot(latent.astype(cdt), w3_ref[...], preferred_element_type=jnp.float32)
    z = jnp.maximum(z + b3_ref[...], 0.0)
    z = jnp.dot(z.astype(cdt), w4_ref[...], preferred_element_type=jnp.float32)
    z = jnp.maximum(z + b4_ref[...], 0.0)

    # Final N=1 layer as a lane reduction (VPU multiply + XLU reduce) instead of
    # an MXU push/drain for 32 useful MACs.
    q = jnp.sum(z * w5_ref[...], axis=-1, keepdims=True) + b5_ref[...]
    q_ref[...] = q


# ----------------------------------------------------------------------------
# Wrapper
# ----------------------------------------------------------------------------
def vectorized_qnet_forward(s, a, fused_params, *, block_m=1024):
    """s: (B, state_dim), a: (B, action_dim), fused_params: output of pack_params()."""
    (w1, b1, w2, b2, w3, b3, w4, b4, w5, b5) = fused_params
    weights = [w1, b1, w2, b2, w3, b3, w4, b4, w5, b5]

    B = s.shape[0]
    sa = jnp.concatenate([s.astype(jnp.float32), a.astype(jnp.float32)], axis=-1)
    in_dim = sa.shape[1]

    # Batch tile: full batch if it is small, otherwise a multiple-of-8 tile.
    tm = B if B <= block_m else block_m
    grid = (pl.cdiv(B, tm),)

    def const_spec(arr):
        # Weights/biases: one block == the whole array, constant index -> VMEM
        # resident for the whole grid, DMA'd exactly once.
        return pl.BlockSpec(arr.shape, lambda i: (0, 0))

    flops = 2 * B * (
        w1.shape[0] * w1.shape[1]
        + w2.shape[0] * w2.shape[1]
        + w3.shape[0] * w3.shape[1]
        + w4.shape[0] * w4.shape[1]
        + w5.shape[1]
    )
    bytes_accessed = (
        sa.size * 4 + B * 4 + sum(int(w.size) * w.dtype.itemsize for w in weights)
    )
    cost = pl.CostEstimate(flops=flops, transcendentals=0, bytes_accessed=bytes_accessed)

    # NOTE: output last dim is 1 (masked partial stores); at these byte counts this
    # is negligible vs. the matmuls — see perf review item on lane-dense outputs.
    return pl.pallas_call(
        _qnet_kernel,
        out_shape=jax.ShapeDtypeStruct((B, 1), jnp.float32),
        grid=grid,
        in_specs=[pl.BlockSpec((tm, in_dim), lambda i: (i, 0))]
        + [const_spec(w) for w in weights],
        out_specs=pl.BlockSpec((tm, 1), lambda i: (i, 0)),
        compiler_params=pltpu.CompilerParams(
            dimension_semantics=("parallel",),        # megacore sharding on v7x
            vmem_limit_bytes=48 * 1024 * 1024,        # safe on v7x's 64 MiB VMEM
        ),
        cost_estimate=cost,
    )(sa, *weights)


# ----------------------------------------------------------------------------
# Parameter construction / packing
# ----------------------------------------------------------------------------
def _linear_init(key, fan_in, fan_out):
    # Mimics torch.nn.Linear default init: U(-1/sqrt(fan_in), +1/sqrt(fan_in)).
    kw, kb = jax.random.split(key)
    bound = 1.0 / jnp.sqrt(float(fan_in))
    w = jax.random.uniform(kw, (fan_in, fan_out), jnp.float32, -bound, bound)
    b = jax.random.uniform(kb, (1, fan_out), jnp.float32, -bound, bound)
    return w, b


def init_params(key, state_dim, action_dim, latent_dim=128,
                action_head_architecture=(128,), state_head_architecture=(128,),
                latent_mlp_architecture=(64, 32)):
    keys = jax.random.split(key, 7)
    sw1, sb1 = _linear_init(keys[0], state_dim, state_head_architecture[0])
    sw2, sb2 = _linear_init(keys[1], state_head_architecture[0], latent_dim)
    aw1, ab1 = _linear_init(keys[2], action_dim, action_head_architecture[0])
    aw2, ab2 = _linear_init(keys[3], action_head_architecture[0], latent_dim)
    lw1, lb1 = _linear_init(keys[4], 2 * latent_dim, latent_mlp_architecture[0])
    lw2, lb2 = _linear_init(keys[5], latent_mlp_architecture[0], latent_mlp_architecture[1])
    lw3, lb3 = _linear_init(keys[6], latent_mlp_architecture[1], 1)
    return [sw1, sb1, sw2, sb2, aw1, ab1, aw2, ab2, lw1, lb1, lw2, lb2, lw3, lb3]


def _block_diag(a, b):
    top = jnp.concatenate([a, jnp.zeros((a.shape[0], b.shape[1]), a.dtype)], axis=1)
    bot = jnp.concatenate([jnp.zeros((b.shape[0], a.shape[1]), b.dtype), b], axis=1)
    return jnp.concatenate([top, bot], axis=0)


def pack_params(params, *, matmul_dtype=jnp.bfloat16):
    """Fuse state/action heads into block-diagonal weights; bf16 matmul weights."""
    (sw1, sb1, sw2, sb2, aw1, ab1, aw2, ab2,
     lw1, lb1, lw2, lb2, lw3, lb3) = params
    # Packed input is [s | a] => state columns first in the block-diagonals, so the
    # fused layer-2 output columns are exactly [h_state | h_action] (torch.cat order).
    w1 = _block_diag(sw1, aw1).astype(matmul_dtype)
    b1 = jnp.concatenate([sb1, ab1], axis=-1).astype(jnp.float32)
    w2 = _block_diag(sw2, aw2).astype(matmul_dtype)
    b2 = jnp.concatenate([sb2, ab2], axis=-1).astype(jnp.float32)
    w3 = lw1.astype(matmul_dtype)
    b3 = lb1.astype(jnp.float32)
    w4 = lw2.astype(matmul_dtype)
    b4 = lb2.astype(jnp.float32)
    w5 = lw3.T.astype(jnp.float32)   # (1, 32) row vector, used as a VPU reduce
    b5 = lb3.astype(jnp.float32)     # (1, 1)
    return (w1, b1, w2, b2, w3, b3, w4, b4, w5, b5)


# ----------------------------------------------------------------------------
# References
# ----------------------------------------------------------------------------
def reference_forward(s, a, params):
    """Pure-f32 reference of the PyTorch module forward."""
    (sw1, sb1, sw2, sb2, aw1, ab1, aw2, ab2,
     lw1, lb1, lw2, lb2, lw3, lb3) = params
    relu = lambda x: jnp.maximum(x, 0.0)
    h_state = relu(relu(s @ sw1 + sb1) @ sw2 + sb2)
    h_action = relu(relu(a @ aw1 + ab1) @ aw2 + ab2)
    latent = jnp.concatenate([h_state, h_action], axis=-1)
    z = relu(latent @ lw1 + lb1)
    z = relu(z @ lw2 + lb2)
    return z @ lw3 + lb3


def reference_forward_fused(sa, fused_params):
    """Reference emulating the kernel's bf16-matmul / f32-accumulate math."""
    (w1, b1, w2, b2, w3, b3, w4, b4, w5, b5) = fused_params
    relu = lambda x: jnp.maximum(x, 0.0)
    mm = lambda x, w: jnp.dot(x.astype(w.dtype), w, preferred_element_type=jnp.float32)
    h = relu(mm(sa, w1) + b1)
    latent = relu(mm(h, w2) + b2)
    z = relu(mm(latent, w3) + b3)
    z = relu(mm(z, w4) + b4)
    return jnp.sum(z * w5, axis=-1, keepdims=True) + b5


# ----------------------------------------------------------------------------
# Demo / self-test
# ----------------------------------------------------------------------------
if __name__ == "__main__":
    B, STATE_DIM, ACTION_DIM = 8, 16, 8

    key = jax.random.PRNGKey(0)
    k_s, k_a, k_p = jax.random.split(key, 3)
    s = jax.random.normal(k_s, (B, STATE_DIM), jnp.float32)
    a = jax.random.normal(k_a, (B, ACTION_DIM), jnp.float32)

    params = init_params(k_p, STATE_DIM, ACTION_DIM)
    fused = pack_params(params)

    q = vectorized_qnet_forward(s, a, fused)
    q = jax.block_until_ready(q)

    sa = jnp.concatenate([s, a], axis=-1)
    q_ref_bf16 = reference_forward_fused(sa, fused)     # same precision as kernel
    q_ref_f32 = reference_forward(s, a, params)          # full f32 module reference

    assert q.shape == (B, 1)
    assert jnp.allclose(q, q_ref_bf16, atol=1e-3, rtol=1e-3)
    assert jnp.allclose(q, q_ref_f32, atol=5e-2, rtol=5e-2)

    print("KERNEL_OK")
</pallas_src>

<mosaic_0001>
module attributes {stable_mosaic.version = 11 : i64} {
  func.func @_qnet_kernel(%arg0: i32, %arg1: memref<8x24xf32, #tpu.memory_space<vmem>>, %arg2: memref<24x256xbf16, #tpu.memory_space<vmem>>, %arg3: memref<1x256xf32, #tpu.memory_space<vmem>>, %arg4: memref<256x256xbf16, #tpu.memory_space<vmem>>, %arg5: memref<1x256xf32, #tpu.memory_space<vmem>>, %arg6: memref<256x64xbf16, #tpu.memory_space<vmem>>, %arg7: memref<1x64xf32, #tpu.memory_space<vmem>>, %arg8: memref<64x32xbf16, #tpu.memory_space<vmem>>, %arg9: memref<1x32xf32, #tpu.memory_space<vmem>>, %arg10: memref<1x32xf32, #tpu.memory_space<vmem>>, %arg11: memref<1x1xf32, #tpu.memory_space<vmem>>, %arg12: memref<8x1xf32, #tpu.memory_space<vmem>>) attributes {dimension_semantics = [#tpu.dimension_semantics<parallel>], iteration_bounds = array<i64: 1>, scalar_prefetch = 0 : i64, scratch_operands = 0 : i64, tpu.core_type = #tpu.core_type<tc>, window_params = [{transform_indices = @transform_0, window_bounds = array<i64: 8, 24>}, {pipeline_mode = #tpu.pipeline_mode<synchronous>, transform_indices = @transform_1, window_bounds = array<i64: 24, 256>}, {pipeline_mode = #tpu.pipeline_mode<synchronous>, transform_indices = @transform_2, window_bounds = array<i64: 1, 256>}, {pipeline_mode = #tpu.pipeline_mode<synchronous>, transform_indices = @transform_3, window_bounds = array<i64: 256, 256>}, {pipeline_mode = #tpu.pipeline_mode<synchronous>, transform_indices = @transform_4, window_bounds = array<i64: 1, 256>}, {pipeline_mode = #tpu.pipeline_mode<synchronous>, transform_indices = @transform_5, window_bounds = array<i64: 256, 64>}, {pipeline_mode = #tpu.pipeline_mode<synchronous>, transform_indices = @transform_6, window_bounds = array<i64: 1, 64>}, {pipeline_mode = #tpu.pipeline_mode<synchronous>, transform_indices = @transform_7, window_bounds = array<i64: 64, 32>}, {pipeline_mode = #tpu.pipeline_mode<synchronous>, transform_indices = @transform_8, window_bounds = array<i64: 1, 32>}, {pipeline_mode = #tpu.pipeline_mode<synchronous>, transform_indices = @transform_9, window_bounds = array<i64: 1, 32>}, {pipeline_mode = #tpu.pipeline_mode<synchronous>, transform_indices = @transform_10, window_bounds = array<i64: 1, 1>}, {transform_indices = @transform_11, window_bounds = array<i64: 8, 1>}]} {
    %c0 = arith.constant 0 : index
    %c0_0 = arith.constant 0 : index
    %0 = vector.load %arg1[%c0, %c0_0] : memref<8x24xf32, #tpu.memory_space<vmem>>, vector<8x24xf32>
    %1 = arith.truncf %0 : vector<8x24xf32> to vector<8x24xbf16>
    %c0_1 = arith.constant 0 : index
    %c0_2 = arith.constant 0 : index
    %2 = vector.load %arg2[%c0_1, %c0_2] : memref<24x256xbf16, #tpu.memory_space<vmem>>, vector<24x256xbf16>
    %cst = arith.constant dense<0.000000e+00> : vector<8x256xf32>
    %3 = tpu.matmul %1, %2, %cst {dimension_numbers = #tpu.dot_dimension_numbers<[1], [0], [0], [1], [0, 0, 1, 1], [], []>} : vector<8x24xbf16>, vector<24x256xbf16>, vector<8x256xf32> -> vector<8x256xf32>
    %c0_3 = arith.constant 0 : index
    %c0_4 = arith.constant 0 : index
    %4 = vector.load %arg3[%c0_3, %c0_4] : memref<1x256xf32, #tpu.memory_space<vmem>>, vector<1x256xf32>
    %5 = vector.broadcast %4 : vector<1x256xf32> to vector<8x256xf32>
    %6 = arith.addf %3, %5 : vector<8x256xf32>
    %cst_5 = arith.constant 0.000000e+00 : f32
    %7 = vector.broadcast %cst_5 : f32 to vector<8x256xf32>
    %8 = arith.maximumf %6, %7 : vector<8x256xf32>
    %9 = arith.truncf %8 : vector<8x256xf32> to vector<8x256xbf16>
    %c0_6 = arith.constant 0 : index
    %c0_7 = arith.constant 0 : index
    %10 = vector.load %arg4[%c0_6, %c0_7] : memref<256x256xbf16, #tpu.memory_space<vmem>>, vector<256x256xbf16>
    %cst_8 = arith.constant dense<0.000000e+00> : vector<8x256xf32>
    %11 = tpu.matmul %9, %10, %cst_8 {dimension_numbers = #tpu.dot_dimension_numbers<[1], [0], [0], [1], [0, 0, 1, 1], [], []>} : vector<8x256xbf16>, vector<256x256xbf16>, vector<8x256xf32> -> vector<8x256xf32>
    %c0_9 = arith.constant 0 : index
    %c0_10 = arith.constant 0 : index
    %12 = vector.load %arg5[%c0_9, %c0_10] : memref<1x256xf32, #tpu.memory_space<vmem>>, vector<1x256xf32>
    %13 = vector.broadcast %12 : vector<1x256xf32> to vector<8x256xf32>
    %14 = arith.addf %11, %13 : vector<8x256xf32>
    %cst_11 = arith.constant 0.000000e+00 : f32
    %15 = vector.broadcast %cst_11 : f32 to vector<8x256xf32>
    %16 = arith.maximumf %14, %15 : vector<8x256xf32>
    %17 = arith.truncf %16 : vector<8x256xf32> to vector<8x256xbf16>
    %c0_12 = arith.constant 0 : index
    %c0_13 = arith.constant 0 : index
    %18 = vector.load %arg6[%c0_12, %c0_13] : memref<256x64xbf16, #tpu.memory_space<vmem>>, vector<256x64xbf16>
    %cst_14 = arith.constant dense<0.000000e+00> : vector<8x64xf32>
    %19 = tpu.matmul %17, %18, %cst_14 {dimension_numbers = #tpu.dot_dimension_numbers<[1], [0], [0], [1], [0, 0, 1, 1], [], []>} : vector<8x256xbf16>, vector<256x64xbf16>, vector<8x64xf32> -> vector<8x64xf32>
    %c0_15 = arith.constant 0 : index
    %c0_16 = arith.constant 0 : index
    %20 = vector.load %arg7[%c0_15, %c0_16] : memref<1x64xf32, #tpu.memory_space<vmem>>, vector<1x64xf32>
    %21 = vector.broadcast %20 : vector<1x64xf32> to vector<8x64xf32>
    %22 = arith.addf %19, %21 : vector<8x64xf32>
    %cst_17 = arith.constant 0.000000e+00 : f32
    %23 = vector.broadcast %cst_17 : f32 to vector<8x64xf32>
    %24 = arith.maximumf %22, %23 : vector<8x64xf32>
    %25 = arith.truncf %24 : vector<8x64xf32> to vector<8x64xbf16>
    %c0_18 = arith.constant 0 : index
    %c0_19 = arith.constant 0 : index
    %26 = vector.load %arg8[%c0_18, %c0_19] : memref<64x32xbf16, #tpu.memory_space<vmem>>, vector<64x32xbf16>
    %cst_20 = arith.constant dense<0.000000e+00> : vector<8x32xf32>
    %27 = tpu.matmul %25, %26, %cst_20 {dimension_numbers = #tpu.dot_dimension_numbers<[1], [0], [0], [1], [0, 0, 1, 1], [], []>} : vector<8x64xbf16>, vector<64x32xbf16>, vector<8x32xf32> -> vector<8x32xf32>
    %c0_21 = arith.constant 0 : index
    %c0_22 = arith.constant 0 : index
    %28 = vector.load %arg9[%c0_21, %c0_22] : memref<1x32xf32, #tpu.memory_space<vmem>>, vector<1x32xf32>
    %29 = vector.broadcast %28 : vector<1x32xf32> to vector<8x32xf32>
    %30 = arith.addf %27, %29 : vector<8x32xf32>
    %cst_23 = arith.constant 0.000000e+00 : f32
    %31 = vector.broadcast %cst_23 : f32 to vector<8x32xf32>
    %32 = arith.maximumf %30, %31 : vector<8x32xf32>
    %c0_24 = arith.constant 0 : index
    %c0_25 = arith.constant 0 : index
    %33 = vector.load %arg10[%c0_24, %c0_25] : memref<1x32xf32, #tpu.memory_space<vmem>>, vector<1x32xf32>
    %34 = vector.broadcast %33 : vector<1x32xf32> to vector<8x32xf32>
    %35 = arith.mulf %32, %34 : vector<8x32xf32>
    %cst_26 = arith.constant dense<0.000000e+00> : vector<8xf32>
    %36 = vector.multi_reduction <add>, %35, %cst_26 [1] : vector<8x32xf32> to vector<8xf32>
    %37 = vector.shape_cast %36 : vector<8xf32> to vector<8x1xf32>
    %c0_27 = arith.constant 0 : index
    %c0_28 = arith.constant 0 : index
    %38 = vector.load %arg11[%c0_27, %c0_28] : memref<1x1xf32, #tpu.memory_space<vmem>>, vector<1x1xf32>
    %39 = vector.broadcast %38 : vector<1x1xf32> to vector<8x1xf32>
    %40 = arith.addf %37, %39 : vector<8x1xf32>
    %c0_29 = arith.constant 0 : index
    %c0_30 = arith.constant 0 : index
    %41 = vector.load %arg12[%c0_29, %c0_30] : memref<8x1xf32, #tpu.memory_space<vmem>>, vector<8x1xf32>
    tpu.vector_store %arg12[%c0_29, %c0_30], %40 {strides = array<i32>} : memref<8x1xf32, #tpu.memory_space<vmem>>, vector<8x1xf32>,
    return
  }
  func.func @transform_0(%arg0: i32) -> (i32, i32) {
    %c0_i32 = arith.constant 0 : i32
    %c0_i32_0 = arith.constant 0 : i32
    return %arg0, %c0_i32 : i32, i32
  }
  func.func @transform_1(%arg0: i32) -> (i32, i32) {
    %c0_i32 = arith.constant 0 : i32
    %c0_i32_0 = arith.constant 0 : i32
    %c0_i32_1 = arith.constant 0 : i32
    return %c0_i32, %c0_i32_0 : i32, i32
  }
  func.func @transform_2(%arg0: i32) -> (i32, i32) {
    %c0_i32 = arith.constant 0 : i32
    %c0_i32_0 = arith.constant 0 : i32
    %c0_i32_1 = arith.constant 0 : i32
    return %c0_i32, %c0_i32_0 : i32, i32
  }
  func.func @transform_3(%arg0: i32) -> (i32, i32) {
    %c0_i32 = arith.constant 0 : i32
    %c0_i32_0 = arith.constant 0 : i32
    %c0_i32_1 = arith.constant 0 : i32
    return %c0_i32, %c0_i32_0 : i32, i32
  }
  func.func @transform_4(%arg0: i32) -> (i32, i32) {
    %c0_i32 = arith.constant 0 : i32
    %c0_i32_0 = arith.constant 0 : i32
    %c0_i32_1 = arith.constant 0 : i32
    return %c0_i32, %c0_i32_0 : i32, i32
  }
  func.func @transform_5(%arg0: i32) -> (i32, i32) {
    %c0_i32 = arith.constant 0 : i32
    %c0_i32_0 = arith.constant 0 : i32
    %c0_i32_1 = arith.constant 0 : i32
    return %c0_i32, %c0_i32_0 : i32, i32
  }
  func.func @transform_6(%arg0: i32) -> (i32, i32) {
    %c0_i32 = arith.constant 0 : i32
    %c0_i32_0 = arith.constant 0 : i32
    %c0_i32_1 = arith.constant 0 : i32
    return %c0_i32, %c0_i32_0 : i32, i32
  }
  func.func @transform_7(%arg0: i32) -> (i32, i32) {
    %c0_i32 = arith.constant 0 : i32
    %c0_i32_0 = arith.constant 0 : i32
    %c0_i32_1 = arith.constant 0 : i32
    return %c0_i32, %c0_i32_0 : i32, i32
  }
  func.func @transform_8(%arg0: i32) -> (i32, i32) {
    %c0_i32 = arith.constant 0 : i32
    %c0_i32_0 = arith.constant 0 : i32
    %c0_i32_1 = arith.constant 0 : i32
    return %c0_i32, %c0_i32_0 : i32, i32
  }
  func.func @transform_9(%arg0: i32) -> (i32, i32) {
    %c0_i32 = arith.constant 0 : i32
    %c0_i32_0 = arith.constant 0 : i32
    %c0_i32_1 = arith.constant 0 : i32
    return %c0_i32, %c0_i32_0 : i32, i32
  }
  func.func @transform_10(%arg0: i32) -> (i32, i32) {
    %c0_i32 = arith.constant 0 : i32
    %c0_i32_0 = arith.constant 0 : i32
    %c0_i32_1 = arith.constant 0 : i32
    return %c0_i32, %c0_i32_0 : i32, i32
  }
  func.func @transform_11(%arg0: i32) -> (i32, i32) {
    %c0_i32 = arith.constant 0 : i32
    %c0_i32_0 = arith.constant 0 : i32
    return %arg0, %c0_i32 : i32, i32
  }
}

</mosaic_0001>

<bundles_post_ra>
// kernel: tpu_custom_call.1
= control target key start
LH: loop header
LB: loop body
LE: loop exit
PB: predicated region body
PF: predicated region fallthrough
CT: control target
= control target key end

     0   :  { %s1045_s0 = inlined_call_operand.vmem [shape: f32[8,24], index: 0, kind: input, shape index: {}]   ;;  %s1046_s1 = inlined_call_operand.vmem [shape: bf16[24,256], index: 1, kind: input, shape index: {}]   ;;  %s1047_s2 = inlined_call_operand.vmem [shape: f32[1,256], index: 2, kind: input, shape index: {}]   ;;  %s1048_s3 = inlined_call_operand.hbm [shape: bf16[256,256], index: 3, kind: input, shape index: {}]   ;;  %s1049_s4 = inlined_call_operand.vmem [shape: f32[1,256], index: 4, kind: input, shape index: {}]   ;;  %s1050_s5 = inlined_call_operand.vmem [shape: bf16[256,64], index: 5, kind: input, shape index: {}]   ;;  %s1051_s6 = inlined_call_operand.vmem [shape: f32[1,64], index: 6, kind: input, shape index: {}]   ;;  %s1052_s7 = inlined_call_operand.vmem [shape: bf16[64,32], index: 7, kind: input, shape index: {}]   ;;  %s1053_s8 = inlined_call_operand.vmem [shape: f32[1,32], index: 8, kind: input, shape index: {}]   ;;  %s1054_s9 = inlined_call_operand.vmem [shape: f32[1,32], index: 9, kind: input, shape index: {}]   ;;  %s1055_s10 = inlined_call_operand.<no memory space> [shape: f32[1,1], index: 10, kind: input, shape index: {}]   ;;  %s1056_s11 = inlined_call_operand.vmem [shape: f32[8,1], index: 11, kind: output, shape index: {}]  }
   0x1   :  { %v16_v0 = vstv %s1055_s10 }
   0x2   :  { %17 = vst [vmem:[#allocation2] sm:$0x1] %v16_v0 }
   0x3   :  { %18 = vsyncpa [#allocation4], 0  ;;  %s883_s19 = smov [#allocation3]  }
   0x4   :  { %s30_s20 = sshll.u32 %s883_s19, 4  ;;  %s31_s20 = int_to_ptr.vmem [resolvable:$true] %s30_s20 }
   0x5   :  { %s869_s21 = scalar_lea.vmem %s31_s20, 4096  ;;  %p874_p1 = scmp.lt.s32.totalorder %s31_s20, %s31_s20 }
   0x6   :  { %p870_p0 = scmp.ne.s32.totalorder %s31_s20, %s869_s21  ;;  %p875_p2 = scmp.lt.s32.totalorder %s869_s21, %s869_s21 }
   0x8   :  { %p876_p3 = por %p875_p2, %p874_p1 }
   0xa   :  { %p877_p4 = pnand %p876_p3, %p870_p0 }
   0xc   :  { %880 = shalt.err (!%p877_p4)
}
   0xd   :  { %s884_s22 = smov 128   ;;  %s885_s23 = smov 8  }
   0xe   :  { %36 = dma.hbm_to_vmem [thread:$0]  %s1048_s3, 4096, %s31_s20, [#allocation4], %s884_s22, %s884_s22, %s885_s23  }
   0xf   :  { %881 = dma.done.wait [#allocation4], 4096  }
  0x10   :  { %882 = vsyncadd [#allocation4], 4294963200  ;;  %v886_v1 = vmov 0   ;;  %v59_v2 = vld [vmem:[%s1046_s1 + $0x10] sm:$0xff]  ;;  %vm91_vm0 = vcmask 1043456   ;;  %v55_v10 = vld [vmem:[%s1045_s0] sm:$0xff]  ;;  %v62_v54 = vlaneseq }
  0x11   :  { %130 = vmatprep.mubr.bf16.mxu0 %v886_v1  ;;  %v683_v3 = vcombine.high %v59_v2, %v59_v2  ;;  %v682_v4 = vcombine.low %v59_v2, %v59_v2  ;;  %v790_v5 = vld [vmem:[%s1046_s1 + $0x4] ss:$8 sps:$4 sm:$0xff]   ;;  %v792_v6 = vld [vmem:[%s1046_s1] ss:$8 sps:$4 sm:$0xff]   ;;  %v795_v9 = vld [vmem:[#allocation3 + $0x70] ss:$8 sps:$4 sm:$0xff]   ;;  %v56_v14 = vpack.c.bf16 %v55_v10, %v55_v10 }
  0x12   :  { %v793_v7 = vld [vmem:[#allocation3 + $0x74] ss:$8 sps:$4 sm:$0xff]   ;;  %v796_v11 = vld [vmem:[#allocation3 + $0x64] ss:$8 sps:$4 sm:$0xff]   ;;  %v798_v12 = vld [vmem:[#allocation3 + $0x60] ss:$8 sps:$4 sm:$0xff]  }
  0x13   :  { %684 = vmatprep.subr.msk.bf16.mxu0 %vm91_vm0, %v683_v3  ;;  %v93_v8 = vsel %vm91_vm0, %v682_v4, 0  ;;  %347 = vmatprep.subr.bf16.mxu1 %v793_v7  ;;  %v799_v13 = vld [vmem:[#allocation3 + $0x54] ss:$8 sps:$4 sm:$0xff]   ;;  %vm87_vm1 = vcmask 195584   ;;  %v801_v15 = vld [vmem:[#allocation3 + $0x50] ss:$8 sps:$4 sm:$0xff]  }
  0x14   :  { %111 = vmatpush1.bf16.msra.mxu0 %v93_v8  ;;  %348 = vmatpush1.bf16.msra.mxu1 %v795_v9  ;;  %v802_v16 = vld [vmem:[#allocation3 + $0x44] ss:$8 sps:$4 sm:$0xff]   ;;  %v804_v17 = vld [vmem:[#allocation3 + $0x40] ss:$8 sps:$4 sm:$0xff]   ;;  %v805_v18 = vld [vmem:[#allocation3 + $0x34] ss:$8 sps:$4 sm:$0xff]  }
  0x15   :  { %112 = vmatprep.subr.bf16.mxu0 %v790_v5  ;;  %349 = vmatprep.subr.bf16.mxu1 %v796_v11  ;;  %v807_v19 = vld [vmem:[#allocation3 + $0x30] ss:$8 sps:$4 sm:$0xff]   ;;  %v808_v20 = vld [vmem:[#allocation3 + $0x24] ss:$8 sps:$4 sm:$0xff]   ;;  %v810_v21 = vld [vmem:[#allocation3 + $0x20] ss:$8 sps:$4 sm:$0xff]  }
  0x16   :  { %v811_v22 = vld [vmem:[#allocation3 + $0x14] ss:$8 sps:$4 sm:$0xff]   ;;  %v813_v23 = vld [vmem:[#allocation3 + $0x10] ss:$8 sps:$4 sm:$0xff]   ;;  %v814_v24 = vld [vmem:[#allocation3 + $0x4] ss:$8 sps:$4 sm:$0xff]  }
  0x17   :  { %v816_v25 = vld [vmem:[#allocation3] ss:$8 sps:$4 sm:$0xff]   ;;  %v817_v26 = vld [vmem:[#allocation3 + $0xf4] ss:$8 sps:$4 sm:$0xff]   ;;  %v819_v27 = vld [vmem:[#allocation3 + $0xf0] ss:$8 sps:$4 sm:$0xff]  }
  0x18   :  { %113 = vmatpush1.bf16.msra.mxu0 %v792_v6  ;;  %350 = vmatpush1.bf16.msra.mxu1 %v798_v12  ;;  %v820_v28 = vld [vmem:[#allocation3 + $0xe4] ss:$8 sps:$4 sm:$0xff]   ;;  %v822_v29 = vld [vmem:[#allocation3 + $0xe0] ss:$8 sps:$4 sm:$0xff]   ;;  %v823_v30 = vld [vmem:[#allocation3 + $0xd4] ss:$8 sps:$4 sm:$0xff]  }
  0x19   :  { %351 = vmatprep.subr.bf16.mxu1 %v799_v13  ;;  %v825_v31 = vld [vmem:[#allocation3 + $0xd0] ss:$8 sps:$4 sm:$0xff]   ;;  %v826_v32 = vld [vmem:[#allocation3 + $0xc4] ss:$8 sps:$4 sm:$0xff]   ;;  %v828_v33 = vld [vmem:[#allocation3 + $0xc0] ss:$8 sps:$4 sm:$0xff]  }
  0x1a   :  { %v829_v34 = vld [vmem:[#allocation3 + $0xb4] ss:$8 sps:$4 sm:$0xff]   ;;  %v831_v35 = vld [vmem:[#allocation3 + $0xb0] ss:$8 sps:$4 sm:$0xff]   ;;  %v832_v36 = vld [vmem:[#allocation3 + $0xa4] ss:$8 sps:$4 sm:$0xff]  }
  0x1b   :  { %685 = vmatmul.mubr.msk.bf16.vlgmr.msra.gmra.mxu0 %vm87_vm1, %v56_v14  ;;  %v834_v37 = vld [vmem:[#allocation3 + $0xa0] ss:$8 sps:$4 sm:$0xff]   ;;  %v835_v38 = vld [vmem:[#allocation3 + $0x94] ss:$8 sps:$4 sm:$0xff]   ;;  %v837_v39 = vld [vmem:[#allocation3 + $0x90] ss:$8 sps:$4 sm:$0xff]  }
  0x1c   :  { %352 = vmatpush1.bf16.msra.mxu1 %v801_v15  ;;  %v838_v40 = vld [vmem:[#allocation3 + $0x84] ss:$8 sps:$4 sm:$0xff]   ;;  %v840_v41 = vld [vmem:[#allocation3 + $0x80] ss:$8 sps:$4 sm:$0xff]   ;;  %v841_v42 = vld [vmem:[%s1050_s5 + $0x78] sm:$0xff]   ;;  %v63_v55 = vshrl.u32 %v62_v54, 7 }
  0x1d   :  { %353 = vmatprep.subr.bf16.mxu1 %v802_v16  ;;  %v842_v43 = vld [vmem:[%s1050_s5 + $0x38] sm:$0xff]   ;;  %v843_v44 = vld [vmem:[%s1050_s5 + $0x70] sm:$0xff]   ;;  %743 = vmatprep.subr.bf16.mxu0 %v841_v42  ;;  %v845_v46 = vld [vmem:[%s1050_s5 + $0x68] sm:$0xff]   ;;  %v887_v11 = vmov 0.0   ;;  %vm888_vm2 = vmmov 0   ;;  %vm608_vm3 = vcmask 523264  }
  0x1e   :  { %744 = vmatpush3.bf16.msra.mxu0 %v842_v43  ;;  %v844_v45 = vld [vmem:[%s1050_s5 + $0x30] sm:$0xff]   ;;  %v846_v47 = vld [vmem:[%s1050_s5 + $0x28] sm:$0xff]   ;;  %v847_v48 = vld [vmem:[%s1050_s5 + $0x60] sm:$0xff]   ;;  %v64_v56 = vsub.s32 0, %v63_v55  ;;  %v68_v58 = vsub.s32 1, %v63_v55  ;;  %vm661_vm4 = vcmask 261120  }
  0x1f   :  { %745 = vmatprep.subr.bf16.mxu0 %v843_v44  ;;  %v848_v49 = vld [vmem:[%s1050_s5 + $0x20] sm:$0xff]   ;;  %v849_v50 = vld [vmem:[%s1050_s5 + $0x58] sm:$0xff]   ;;  %v851_v52 = vld [vmem:[%s1050_s5 + $0x50] sm:$0xff]   ;;  %vm673_vm5 = vcmask 7168  }
  0x20   :  { %354 = vmatpush1.bf16.msra.mxu1 %v804_v17  ;;  %v850_v51 = vld [vmem:[%s1050_s5 + $0x18] sm:$0xff]   ;;  %v852_v53 = vld [vmem:[%s1050_s5 + $0x10] sm:$0xff]   ;;  %v60_v57 = vld [vmem:[%s1047_s2] sm:$0x3] }
  0x21   :  { %355 = vmatprep.subr.bf16.mxu1 %v805_v18  ;;  %v65_v59 = vrot.slane %v60_v57, %v64_v56  ;;  %v69_v60 = vrot.slane %v60_v57, %v68_v58  ;;  %v853_v7 = vld [vmem:[%s1050_s5 + $0x48] sm:$0xff]   ;;  %v855_v9 = vld [vmem:[%s1050_s5 + $0x40] sm:$0xff]  }
  0x22   :  { %746 = vmatpush3.bf16.msra.mxu0 %v844_v45  ;;  %v854_v8 = vld [vmem:[%s1050_s5 + $0x8] sm:$0xff]   ;;  %v856_v10 = vld [vmem:[%s1050_s5] sm:$0xff]  }
  0x23   :  { %747 = vmatprep.subr.bf16.mxu0 %v845_v46  ;;  %v175_v12 = vld [vmem:[%s1049_s4] sm:$0x3] }
  0x24   :  { %356 = vmatpush1.bf16.msra.mxu1 %v807_v19  ;;  %v180_v13 = vrot.slane %v175_v12, %v64_v56  ;;  %v184_v14 = vrot.slane %v175_v12, %v68_v58  ;;  %v741_v42 = vld [vmem:[%s1054_s9] ss:$0 sm:$0xff] }
  0x25   :  { %357 = vmatprep.subr.bf16.mxu1 %v808_v20 }
  0x26   :  { %748 = vmatpush3.bf16.msra.mxu0 %v846_v47 }
  0x27   :  { %749 = vmatprep.subr.bf16.mxu0 %v847_v48  ;;  %v742_v48 = vld [vmem:[#allocation2] ss:$0 sm:$0xff] }
  0x28   :  { %358 = vmatpush1.bf16.msra.mxu1 %v810_v21 }
  0x29   :  { %359 = vmatprep.subr.bf16.mxu1 %v811_v22 }
  0x2a   :  { %750 = vmatpush3.bf16.msra.mxu0 %v848_v49 }
  0x2b   :  { %751 = vmatprep.subr.bf16.mxu0 %v849_v50 }
  0x2c   :  { %360 = vmatpush1.bf16.msra.mxu1 %v813_v23 }
  0x2d   :  { %361 = vmatprep.subr.bf16.mxu1 %v814_v24  ;;  %v857_v24 = vld [vmem:[%s1052_s7 + $0x18] sm:$0xff]  }
  0x2e   :  { %752 = vmatpush3.bf16.msra.mxu0 %v850_v51 }
  0x2f   :  { %753 = vmatprep.subr.bf16.mxu0 %v851_v52 }
  0x30   :  { %362 = vmatpush1.bf16.msra.mxu1 %v816_v25 }
  0x31   :  { %363 = vmatprep.subr.bf16.mxu1 %v817_v26  ;;  %v858_v26 = vld [vmem:[%s1052_s7 + $0x10] sm:$0xff]  }
  0x32   :  { %754 = vmatpush3.bf16.msra.mxu0 %v852_v53 }
  0x33   :  { %755 = vmatprep.subr.bf16.mxu0 %v853_v7 }
  0x34   :  { %364 = vmatpush2.bf16.msra.mxu1 %v819_v27  ;;  %v859_v27 = vld [vmem:[%s1052_s7 + $0x8] sm:$0xff]  }
  0x35   :  { %365 = vmatprep.subr.bf16.mxu1 %v820_v28  ;;  %v860_v28 = vld [vmem:[%s1052_s7] sm:$0xff]  }
  0x36   :  { %756 = vmatpush3.bf16.msra.mxu0 %v854_v8 }
  0x37   :  { %757 = vmatprep.subr.bf16.mxu0 %v855_v9 }
  0x38   :  { %366 = vmatpush2.bf16.msra.mxu1 %v822_v29 }
  0x39   :  { %367 = vmatprep.subr.bf16.mxu1 %v823_v30  ;;  %v718_v30 = vld [vmem:[%s1051_s6] ss:$0 sm:$0xff] }
  0x3a   :  { %758 = vmatpush3.bf16.msra.mxu0 %v856_v10 }
  0x3b   :  { %770 = vmatprep.subr.bf16.mxu0 %v887_v11 }
  0x3c   :  { %368 = vmatpush2.bf16.msra.mxu1 %v825_v31 }
  0x3d   :  { %369 = vmatprep.subr.bf16.mxu1 %v826_v32 }
  0x40   :  { %370 = vmatpush2.bf16.msra.mxu1 %v828_v33 }
  0x41   :  { %371 = vmatprep.subr.bf16.mxu1 %v829_v34 }
  0x44   :  { %372 = vmatpush2.bf16.msra.mxu1 %v831_v35 }
  0x45   :  { %373 = vmatprep.subr.bf16.mxu1 %v832_v36 }
  0x48   :  { %374 = vmatpush2.bf16.msra.mxu1 %v834_v37 }
  0x49   :  { %375 = vmatprep.subr.bf16.mxu1 %v835_v38  ;;  %v735_v38 = vld [vmem:[%s1053_s8] ss:$0 sm:$0xff] }
  0x4c   :  { %376 = vmatpush2.bf16.msra.mxu1 %v837_v39 }
  0x4d   :  { %377 = vmatprep.subr.bf16.mxu1 %v838_v40 }
  0x50   :  { %378 = vmatpush2.bf16.msra.mxu1 %v840_v41 }
  0xdb   :  { %v132_v61 = vpop.f32.mrf.mxu0 }
  0xdc   :  { %v133_v62 = vadd.f32 %v132_v61, %v65_v59 }
  0xdd   :  { %v134_v63 = vpop.f32.mrf.mxu0 }
  0xde   :  { %v135_v0 = vadd.f32 %v134_v63, %v69_v60  ;;  %v139_v1 = vmax.f32 %v133_v62, 0.0 }
  0xdf   :  { %v136_v2 = vpop.f32.mrf.mxu0 }
  0xe0   :  { %v140_v3 = vmax.f32 %v135_v0, 0.0  ;;  %v141_v6 = vpack.c.bf16 %v139_v1, %v139_v1 }
  0xe1   :  { %v137_v4 = vpop.f32.mrf.mxu0 }
  0xe2   :  { %v142_v5 = vpack.c.bf16 %v140_v3, %v140_v3 }
  0xe4   :  { %379 = vmatprep.mubr.bf16.mxu1 %v142_v5 }
  0xe5   :  { %380 = vmatmul.mubr.bf16.vlgmr.msra.gmra.mxu1 %v141_v6 }
 0x1a5   :  { %v381_v15 = vpop.f32.mrf.mxu1 }
 0x1a6   :  { %v382_v16 = vadd.f32 %v381_v15, %v180_v13 }
 0x1a7   :  { %v383_v17 = vpop.f32.mrf.mxu1 }
 0x1a8   :  { %v384_v18 = vadd.f32 %v383_v17, %v184_v14  ;;  %v388_v19 = vmax.f32 %v382_v16, 0.0 }
 0x1a9   :  { %v385_v20 = vpop.f32.mrf.mxu1 }
 0x1aa   :  { %v389_v21 = vmax.f32 %v384_v18, 0.0  ;;  %v390_v25 = vpack.c.bf16 %v388_v19, %v388_v19 }
 0x1ab   :  { %v386_v22 = vpop.f32.mrf.mxu1 }
 0x1ac   :  { %v391_v23 = vpack.c.bf16 %v389_v21, %v389_v21 }
 0x1ae   :  { %559 = vmatprep.mubr.bf16.mxu0 %v391_v23 }
 0x1af   :  { %560 = vmatmul.mubr.bf16.vlgmr.msra.gmra.mxu0 %v390_v25 }
 0x1b0   :  { %771 = vmatpush3.bf16.msra.mxu0 %v857_v24  ;;  %778 = vmatprep.mubr.msk.bf16.mxu0 %vm888_vm2, %v887_v11 }
 0x1b1   :  { %772 = vmatprep.subr.bf16.mxu0 %v887_v11 }
 0x1b4   :  { %773 = vmatpush3.bf16.msra.mxu0 %v858_v26 }
 0x1b5   :  { %774 = vmatprep.subr.bf16.mxu0 %v887_v11 }
 0x1b8   :  { %775 = vmatpush3.bf16.msra.mxu0 %v859_v27 }
 0x1b9   :  { %776 = vmatprep.subr.bf16.mxu0 %v887_v11 }
 0x1bc   :  { %777 = vmatpush3.bf16.msra.mxu0 %v860_v28 }
 0x26f   :  { %v759_v29 = vpop.f32.mrf.mxu0 }
 0x271   :  { %v760_v31 = vpop.f32.mrf.mxu0 }
 0x272   :  { %v761_v32 = vadd.f32 %v760_v31, %v759_v29 }
 0x273   :  { %v762_v33 = vpop.f32.mrf.mxu0 }
 0x274   :  { %v562_v34 = vadd.f32 %v761_v32, %v718_v30 }
 0x275   :  { %v763_v35 = vpop.f32.mrf.mxu0 }
 0x276   :  { %v567_v36 = vmax.f32 %v562_v34, 0.0 }
 0x278   :  { %v568_v37 = vpack.c.bf16 %v567_v36, %v567_v36 }
 0x27a   :  { %779 = vmatmul.mubr.msk.bf16.vlgmr.msra.gmra.mxu0 %vm608_vm3, %v568_v37 }
 0x33a   :  { %v646_v39 = vpop.f32.mrf.mxu0 }
 0x33b   :  { %v647_v40 = vadd.f32 %v735_v38, %v646_v39 }
 0x33c   :  { %v780_v41 = vpop.f32.mrf.mxu0 }
 0x33d   :  { %v652_v43 = vmax.f32 %v647_v40, 0.0 }
 0x33e   :  { %v649_v44 = vpop.f32.mrf.mxu0 }
 0x33f   :  { %v660_v45 = vmul.f32 %v741_v42, %v652_v43 }
 0x340   :  { %v781_v46 = vpop.f32.mrf.mxu0 }
 0x341   :  { %v662_v47 = vsel %vm661_vm4, %v660_v45, 0.0 }
 0x342   :  { %663 = vadd.xlane.f32.xlu0 %v662_v47 }
 0x3cb   :  { %v664_v49 = vpop.xlane.xlu0 %663 }
 0x3cc   :  { %v672_v50 = vadd.f32 %v742_v48, %v664_v49 }
 0x3ce   :  { %674 = vst.msk [vmem:[%s1056_s11] sm:$0xff] %vm673_vm5, %v672_v50 }
 0x3cf   :  { %679 = vsyncpa [#allocation4], 1 }

</bundles_post_ra>
